<compile_context>
chip_gen: v7x
topology: tpu7x:2x2x1
jax: 0.10.0
libtpu: 0.0.40
codegen_flags: <defaults>
</compile_context>

<pallas_src>
import jax
import jax.numpy as jnp
from jax.experimental import pallas as pl
from jax.experimental.pallas import tpu as pltpu

NEG_SLOPE = 0.01  # torch.nn.LeakyReLU default


def _leaky(x):
    return jnp.where(x > 0, x, NEG_SLOPE * x)


def bottle_kernel(x_ref, w1_ref, b1_ref, w2_ref, b2_ref, w3_ref, b3_ref, o_ref):
    """Whole BottleBlock forward for one batch tile (3 dense MXU matmuls).

    x_ref : (TB, D)           input tile (original dtype; used for the residual)
    w1_ref: (D, 4*Bd)   bf16  fused first-layer weights of the 4 branches
    b1_ref: (1, 4*Bd)   f32
    w2_ref: (4*Bd, 4*Bd) bf16 block-diagonal second-layer weights
    b2_ref: (1, 4*Bd)   f32
    w3_ref: (4*Bd, D)   bf16  concat_fc weight
    b3_ref: (1, D)      f32
    o_ref : (TB, D)
    """
    x = x_ref[...]
    cdt = w1_ref.dtype  # MXU compute dtype (bf16)

    h = jnp.dot(x.astype(cdt), w1_ref[...], preferred_element_type=jnp.float32)
    h = _leaky(h + b1_ref[...])

    h = jnp.dot(h.astype(cdt), w2_ref[...], preferred_element_type=jnp.float32)
    h = _leaky(h + b2_ref[...])

    y = jnp.dot(h.astype(cdt), w3_ref[...], preferred_element_type=jnp.float32)
    y = y + b3_ref[...]

    o_ref[...] = (x.astype(jnp.float32) + y).astype(o_ref.dtype)  # residual add


def _fuse_params(params, compute_dtype):
    """Fold the stacked per-branch params into 3 dense, MXU-friendly matrices."""
    w1, b1, w2, b2, w3, b3 = params
    n_br, d, bd = w1.shape
    f = n_br * bd
    # First layer: concat branch output columns -> (D, 4*Bd).
    w1f = jnp.transpose(w1, (1, 0, 2)).reshape(d, f)
    b1f = jnp.transpose(b1, (1, 0, 2)).reshape(1, f)
    # Second layer: block-diagonal (4*Bd, 4*Bd); replaces torch.cat entirely.
    w2bd = jnp.zeros((f, f), w2.dtype)
    for i in range(n_br):
        w2bd = w2bd.at[i * bd:(i + 1) * bd, i * bd:(i + 1) * bd].set(w2[i])
    b2f = jnp.transpose(b2, (1, 0, 2)).reshape(1, f)
    return (w1f.astype(compute_dtype), b1f.astype(jnp.float32),
            w2bd.astype(compute_dtype), b2f.astype(jnp.float32),
            w3.astype(compute_dtype), b3.astype(jnp.float32))


def bottle_block(x, params, *, tile_b=None, compute_dtype=jnp.bfloat16):
    """params = (w1, b1, w2, b2, w3, b3) as produced by init_params."""
    B, D = x.shape
    w1f, b1f, w2bd, b2f, w3c, b3c = _fuse_params(params, compute_dtype)
    F = w1f.shape[1]  # 4 * branch_dim

    # Batch tile: big enough to pipeline DMAs / fill the MXU, multiple of 8
    # (or equal to B when B is small).
    if tile_b is None:
        tile_b = B if B <= 512 else 512
    tb = min(tile_b, B)
    grid = (pl.cdiv(B, tb),)

    # Explicit VMEM budget: weights (x2 for pipeline buffering) + io tiles + slack.
    itemsize = jnp.dtype(x.dtype).itemsize
    w_bytes = sum(int(a.size) * jnp.dtype(a.dtype).itemsize
                  for a in (w1f, b1f, w2bd, b2f, w3c, b3c))
    io_bytes = 2 * 2 * tb * D * itemsize          # in + out, double-buffered
    tmp_bytes = 4 * tb * max(F, D) * 4            # rough f32 intermediates
    vmem_limit = int(min(110 << 20,
                         max(32 << 20, 2 * w_bytes + io_bytes + tmp_bytes + (4 << 20))))

    const2d = lambda i: (0, 0)
    return pl.pallas_call(
        bottle_kernel,
        out_shape=jax.ShapeDtypeStruct((B, D), x.dtype),
        grid=grid,
        in_specs=[
            pl.BlockSpec((tb, D), lambda i: (i, 0)),
            pl.BlockSpec(w1f.shape, const2d),
            pl.BlockSpec(b1f.shape, const2d),
            pl.BlockSpec(w2bd.shape, const2d),
            pl.BlockSpec(b2f.shape, const2d),
            pl.BlockSpec(w3c.shape, const2d),
            pl.BlockSpec(b3c.shape, const2d),
        ],
        out_specs=pl.BlockSpec((tb, D), lambda i: (i, 0)),
        compiler_params=pltpu.CompilerParams(
            dimension_semantics=("parallel",),
            vmem_limit_bytes=vmem_limit,
        ),
    )(x, w1f, b1f, w2bd, b2f, w3c, b3c)


def init_params(key, in_dim, bottle_rate):
    branch_dim = int(in_dim / bottle_rate)
    ks = jax.random.split(key, 6)
    scale1 = 1.0 / jnp.sqrt(in_dim)
    scale2 = 1.0 / jnp.sqrt(branch_dim)
    scale3 = 1.0 / jnp.sqrt(4 * branch_dim)
    # stacked branch weights: leading axis = branch index (4 branches)
    w1 = jax.random.uniform(ks[0], (4, in_dim, branch_dim), jnp.float32, -scale1, scale1)
    b1 = jax.random.uniform(ks[1], (4, 1, branch_dim), jnp.float32, -scale1, scale1)
    w2 = jax.random.uniform(ks[2], (4, branch_dim, branch_dim), jnp.float32, -scale2, scale2)
    b2 = jax.random.uniform(ks[3], (4, 1, branch_dim), jnp.float32, -scale2, scale2)
    w3 = jax.random.uniform(ks[4], (4 * branch_dim, in_dim), jnp.float32, -scale3, scale3)
    b3 = jax.random.uniform(ks[5], (1, in_dim), jnp.float32, -scale3, scale3)
    return (w1, b1, w2, b2, w3, b3)


def bottle_block_ref(x, params):
    """Pure-JAX f32 reference mirroring the PyTorch forward."""
    w1, b1, w2, b2, w3, b3 = params
    outs = []
    for br in range(4):
        h = _leaky(x @ w1[br] + b1[br])
        h = _leaky(h @ w2[br] + b2[br])
        outs.append(h)
    concat = jnp.concatenate(outs, axis=1)
    return x + (concat @ w3 + b3)


if __name__ == "__main__":
    in_dim = 32
    bottle_rate = 4
    batch = 8

    key = jax.random.PRNGKey(0)
    kx, kp = jax.random.split(key)
    x = jax.random.normal(kx, (batch, in_dim), jnp.float32)
    params = init_params(kp, in_dim, bottle_rate)

    out = bottle_block(x, params)
    out = jax.block_until_ready(out)

    ref = bottle_block_ref(x, params)
    assert out.shape == (batch, in_dim)
    # bf16 MXU operands (f32 accumulation) vs the pure-f32 reference.
    assert jnp.allclose(out, ref, atol=3e-2, rtol=3e-2), float(jnp.max(jnp.abs(out - ref)))

    print("KERNEL_OK")
</pallas_src>

<mosaic_0001>
module attributes {stable_mosaic.version = 11 : i64} {
  func.func @bottle_kernel(%arg0: i32, %arg1: memref<8x32xf32, #tpu.memory_space<vmem>>, %arg2: memref<32x32xbf16, #tpu.memory_space<vmem>>, %arg3: memref<1x32xf32, #tpu.memory_space<vmem>>, %arg4: memref<32x32xbf16, #tpu.memory_space<vmem>>, %arg5: memref<1x32xf32, #tpu.memory_space<vmem>>, %arg6: memref<32x32xbf16, #tpu.memory_space<vmem>>, %arg7: memref<1x32xf32, #tpu.memory_space<vmem>>, %arg8: memref<8x32xf32, #tpu.memory_space<vmem>>) attributes {dimension_semantics = [#tpu.dimension_semantics<parallel>], iteration_bounds = array<i64: 1>, scalar_prefetch = 0 : i64, scratch_operands = 0 : i64, tpu.core_type = #tpu.core_type<tc>, window_params = [{transform_indices = @transform_0, window_bounds = array<i64: 8, 32>}, {pipeline_mode = #tpu.pipeline_mode<synchronous>, transform_indices = @transform_1, window_bounds = array<i64: 32, 32>}, {pipeline_mode = #tpu.pipeline_mode<synchronous>, transform_indices = @transform_2, window_bounds = array<i64: 1, 32>}, {pipeline_mode = #tpu.pipeline_mode<synchronous>, transform_indices = @transform_3, window_bounds = array<i64: 32, 32>}, {pipeline_mode = #tpu.pipeline_mode<synchronous>, transform_indices = @transform_4, window_bounds = array<i64: 1, 32>}, {pipeline_mode = #tpu.pipeline_mode<synchronous>, transform_indices = @transform_5, window_bounds = array<i64: 32, 32>}, {pipeline_mode = #tpu.pipeline_mode<synchronous>, transform_indices = @transform_6, window_bounds = array<i64: 1, 32>}, {transform_indices = @transform_7, window_bounds = array<i64: 8, 32>}]} {
    %c0 = arith.constant 0 : index
    %c0_0 = arith.constant 0 : index
    %0 = vector.load %arg1[%c0, %c0_0] : memref<8x32xf32, #tpu.memory_space<vmem>>, vector<8x32xf32>
    %1 = arith.truncf %0 : vector<8x32xf32> to vector<8x32xbf16>
    %c0_1 = arith.constant 0 : index
    %c0_2 = arith.constant 0 : index
    %2 = vector.load %arg2[%c0_1, %c0_2] : memref<32x32xbf16, #tpu.memory_space<vmem>>, vector<32x32xbf16>
    %cst = arith.constant dense<0.000000e+00> : vector<8x32xf32>
    %3 = tpu.matmul %1, %2, %cst {dimension_numbers = #tpu.dot_dimension_numbers<[1], [0], [0], [1], [0, 0, 1, 1], [], []>} : vector<8x32xbf16>, vector<32x32xbf16>, vector<8x32xf32> -> vector<8x32xf32>
    %c0_3 = arith.constant 0 : index
    %c0_4 = arith.constant 0 : index
    %4 = vector.load %arg3[%c0_3, %c0_4] : memref<1x32xf32, #tpu.memory_space<vmem>>, vector<1x32xf32>
    %5 = vector.broadcast %4 : vector<1x32xf32> to vector<8x32xf32>
    %6 = arith.addf %3, %5 : vector<8x32xf32>
    %cst_5 = arith.constant 0.000000e+00 : f32
    %7 = vector.broadcast %cst_5 : f32 to vector<8x32xf32>
    %8 = arith.cmpf ogt, %6, %7 : vector<8x32xf32>
    %cst_6 = arith.constant 0.00999999977 : f32
    %9 = vector.broadcast %cst_6 : f32 to vector<8x32xf32>
    %10 = arith.mulf %9, %6 : vector<8x32xf32>
    %11 = arith.select %8, %6, %10 : vector<8x32xi1>, vector<8x32xf32>
    %12 = arith.truncf %11 : vector<8x32xf32> to vector<8x32xbf16>
    %c0_7 = arith.constant 0 : index
    %c0_8 = arith.constant 0 : index
    %13 = vector.load %arg4[%c0_7, %c0_8] : memref<32x32xbf16, #tpu.memory_space<vmem>>, vector<32x32xbf16>
    %cst_9 = arith.constant dense<0.000000e+00> : vector<8x32xf32>
    %14 = tpu.matmul %12, %13, %cst_9 {dimension_numbers = #tpu.dot_dimension_numbers<[1], [0], [0], [1], [0, 0, 1, 1], [], []>} : vector<8x32xbf16>, vector<32x32xbf16>, vector<8x32xf32> -> vector<8x32xf32>
    %c0_10 = arith.constant 0 : index
    %c0_11 = arith.constant 0 : index
    %15 = vector.load %arg5[%c0_10, %c0_11] : memref<1x32xf32, #tpu.memory_space<vmem>>, vector<1x32xf32>
    %16 = vector.broadcast %15 : vector<1x32xf32> to vector<8x32xf32>
    %17 = arith.addf %14, %16 : vector<8x32xf32>
    %cst_12 = arith.constant 0.000000e+00 : f32
    %18 = vector.broadcast %cst_12 : f32 to vector<8x32xf32>
    %19 = arith.cmpf ogt, %17, %18 : vector<8x32xf32>
    %cst_13 = arith.constant 0.00999999977 : f32
    %20 = vector.broadcast %cst_13 : f32 to vector<8x32xf32>
    %21 = arith.mulf %20, %17 : vector<8x32xf32>
    %22 = arith.select %19, %17, %21 : vector<8x32xi1>, vector<8x32xf32>
    %23 = arith.truncf %22 : vector<8x32xf32> to vector<8x32xbf16>
    %c0_14 = arith.constant 0 : index
    %c0_15 = arith.constant 0 : index
    %24 = vector.load %arg6[%c0_14, %c0_15] : memref<32x32xbf16, #tpu.memory_space<vmem>>, vector<32x32xbf16>
    %cst_16 = arith.constant dense<0.000000e+00> : vector<8x32xf32>
    %25 = tpu.matmul %23, %24, %cst_16 {dimension_numbers = #tpu.dot_dimension_numbers<[1], [0], [0], [1], [0, 0, 1, 1], [], []>} : vector<8x32xbf16>, vector<32x32xbf16>, vector<8x32xf32> -> vector<8x32xf32>
    %c0_17 = arith.constant 0 : index
    %c0_18 = arith.constant 0 : index
    %26 = vector.load %arg7[%c0_17, %c0_18] : memref<1x32xf32, #tpu.memory_space<vmem>>, vector<1x32xf32>
    %27 = vector.broadcast %26 : vector<1x32xf32> to vector<8x32xf32>
    %28 = arith.addf %25, %27 : vector<8x32xf32>
    %29 = arith.addf %0, %28 : vector<8x32xf32>
    %c0_19 = arith.constant 0 : index
    %c0_20 = arith.constant 0 : index
    %30 = vector.load %arg8[%c0_19, %c0_20] : memref<8x32xf32, #tpu.memory_space<vmem>>, vector<8x32xf32>
    tpu.vector_store %arg8[%c0_19, %c0_20], %29 {strides = array<i32>} : memref<8x32xf32, #tpu.memory_space<vmem>>, vector<8x32xf32>,
    return
  }
  func.func @transform_0(%arg0: i32) -> (i32, i32) {
    %c0_i32 = arith.constant 0 : i32
    %c0_i32_0 = arith.constant 0 : i32
    return %arg0, %c0_i32 : i32, i32
  }
  func.func @transform_1(%arg0: i32) -> (i32, i32) {
    %c0_i32 = arith.constant 0 : i32
    %c0_i32_0 = arith.constant 0 : i32
    %c0_i32_1 = arith.constant 0 : i32
    return %c0_i32, %c0_i32_0 : i32, i32
  }
  func.func @transform_2(%arg0: i32) -> (i32, i32) {
    %c0_i32 = arith.constant 0 : i32
    %c0_i32_0 = arith.constant 0 : i32
    %c0_i32_1 = arith.constant 0 : i32
    return %c0_i32, %c0_i32_0 : i32, i32
  }
  func.func @transform_3(%arg0: i32) -> (i32, i32) {
    %c0_i32 = arith.constant 0 : i32
    %c0_i32_0 = arith.constant 0 : i32
    %c0_i32_1 = arith.constant 0 : i32
    return %c0_i32, %c0_i32_0 : i32, i32
  }
  func.func @transform_4(%arg0: i32) -> (i32, i32) {
    %c0_i32 = arith.constant 0 : i32
    %c0_i32_0 = arith.constant 0 : i32
    %c0_i32_1 = arith.constant 0 : i32
    return %c0_i32, %c0_i32_0 : i32, i32
  }
  func.func @transform_5(%arg0: i32) -> (i32, i32) {
    %c0_i32 = arith.constant 0 : i32
    %c0_i32_0 = arith.constant 0 : i32
    %c0_i32_1 = arith.constant 0 : i32
    return %c0_i32, %c0_i32_0 : i32, i32
  }
  func.func @transform_6(%arg0: i32) -> (i32, i32) {
    %c0_i32 = arith.constant 0 : i32
    %c0_i32_0 = arith.constant 0 : i32
    %c0_i32_1 = arith.constant 0 : i32
    return %c0_i32, %c0_i32_0 : i32, i32
  }
  func.func @transform_7(%arg0: i32) -> (i32, i32) {
    %c0_i32 = arith.constant 0 : i32
    %c0_i32_0 = arith.constant 0 : i32
    return %arg0, %c0_i32 : i32, i32
  }
}

</mosaic_0001>

<bundles_post_ra>
// kernel: tpu_custom_call.1
= control target key start
LH: loop header
LB: loop body
LE: loop exit
PB: predicated region body
PF: predicated region fallthrough
CT: control target
= control target key end

     0   :  { %12 = vsyncpa [#allocation3], 0  ;;  %s568_s0 = inlined_call_operand.hbm [shape: f32[8,32], index: 0, kind: input, shape index: {}]   ;;  %s569_s1 = inlined_call_operand.hbm [shape: bf16[32,32], index: 1, kind: input, shape index: {}]   ;;  %s570_s2 = inlined_call_operand.vmem [shape: f32[1,32], index: 2, kind: input, shape index: {}]   ;;  %s571_s3 = inlined_call_operand.hbm [shape: bf16[32,32], index: 3, kind: input, shape index: {}]   ;;  %s572_s4 = inlined_call_operand.vmem [shape: f32[1,32], index: 4, kind: input, shape index: {}]   ;;  %s573_s5 = inlined_call_operand.vmem [shape: bf16[32,32], index: 5, kind: input, shape index: {}]   ;;  %s574_s6 = inlined_call_operand.vmem [shape: f32[1,32], index: 6, kind: input, shape index: {}]   ;;  %s575_s7 = inlined_call_operand.hbm [shape: f32[8,32], index: 7, kind: output, shape index: {}]  }
   0x1   :  { %13 = vsyncpa [#allocation6], 0 }
   0x2   :  { %14 = vsyncpa [#allocation4], 0  ;;  %s447_s24 = smov [#allocation5]   ;;  %s353_s28 = scalar_lea.hbm %s569_s1, 256 }
   0x3   :  { %s30_s25 = sshll.u32 %s447_s24, 4  ;;  %p354_p0 = scmp.ne.s32.totalorder %s569_s1, %s353_s28  ;;  %s31_s25 = int_to_ptr.vmem [resolvable:$true] %s30_s25 }
   0x4   :  { %p357_p1 = scmp.lt.u32.totalorder %s353_s28, %s569_s1 }
   0x6   :  { %p359_p2 = pnand %p357_p1, %p354_p0 }
   0x8   :  { %362 = shalt.err (!%p359_p2)
}
   0x9   :  { %s363_s10 = scalar_lea.vmem %s31_s25, 256  ;;  %p368_p4 = scmp.lt.s32.totalorder %s31_s25, %s31_s25 }
   0xa   :  { %p364_p3 = scmp.ne.s32.totalorder %s31_s25, %s363_s10  ;;  %p369_p5 = scmp.lt.s32.totalorder %s363_s10, %s363_s10 }
   0xc   :  { %p370_p6 = por %p369_p5, %p368_p4 }
   0xe   :  { %p371_p7 = pnand %p370_p6, %p364_p3 }
  0x10   :  { %374 = shalt.err (!%p371_p7)
}
  0x11   :  { %s448_s11 = smov 64   ;;  %s449_s12 = smov 4  }
  0x12   :  { %36 = dma.hbm_to_vmem [thread:$0]  %s569_s1, 256, %s31_s25, [#allocation6], %s448_s11, %s448_s11, %s449_s12  }
  0x13   :  { %s450_s15 = smov [#allocation2]   ;;  %s451_s17 = smov [#allocation7]  }
  0x14   :  { %s21_s16 = sshll.u32 %s450_s15, 4  ;;  %s44_s18 = sshll.u32 %s451_s17, 4  ;;  %s22_s16 = int_to_ptr.vmem [resolvable:$true] %s21_s16  ;;  %s45_s18 = int_to_ptr.vmem [resolvable:$true] %s44_s18 }
  0x15   :  { %s375_s21 = scalar_lea.hbm %s568_s0, 128 }
  0x16   :  { %p376_p8 = scmp.ne.s32.totalorder %s568_s0, %s375_s21  ;;  %p379_p9 = scmp.lt.u32.totalorder %s375_s21, %s568_s0 }
  0x18   :  { %p381_p10 = pnand %p379_p9, %p376_p8 }
  0x1a   :  { %384 = shalt.err (!%p381_p10)
}
  0x1b   :  { %s385_s1 = scalar_lea.vmem %s22_s16, 128  ;;  %p390_p12 = scmp.lt.s32.totalorder %s22_s16, %s22_s16 }
  0x1c   :  { %p386_p11 = scmp.ne.s32.totalorder %s22_s16, %s385_s1  ;;  %p391_p13 = scmp.lt.s32.totalorder %s385_s1, %s385_s1 }
  0x1e   :  { %p392_p0 = por %p391_p13, %p390_p12 }
  0x20   :  { %p393_p1 = pnand %p392_p0, %p386_p11 }
  0x22   :  { %396 = shalt.err (!%p393_p1)
}
  0x23   :  { %24 = dma.hbm_to_vmem [thread:$0]  %s568_s0, 128, %s22_s16, [#allocation3]  }
  0x24   :  { %s397_s30 = scalar_lea.hbm %s571_s3, 256 }
  0x25   :  { %p398_p2 = scmp.ne.s32.totalorder %s571_s3, %s397_s30  ;;  %p401_p3 = scmp.lt.u32.totalorder %s397_s30, %s571_s3 }
  0x27   :  { %p403_p4 = pnand %p401_p3, %p398_p2 }
  0x29   :  { %406 = shalt.err (!%p403_p4)
}
  0x2a   :  { %s407_s14 = scalar_lea.vmem %s45_s18, 256  ;;  %p412_p6 = scmp.lt.s32.totalorder %s45_s18, %s45_s18 }
  0x2b   :  { %p408_p5 = scmp.ne.s32.totalorder %s45_s18, %s407_s14  ;;  %p413_p7 = scmp.lt.s32.totalorder %s407_s14, %s407_s14 }
  0x2d   :  { %p414_p8 = por %p413_p7, %p412_p6 }
  0x2f   :  { %p415_p9 = pnand %p414_p8, %p408_p5 }
  0x31   :  { %418 = shalt.err (!%p415_p9)
}
  0x32   :  { %50 = dma.hbm_to_vmem [thread:$0]  %s571_s3, 256, %s45_s18, [#allocation6], %s448_s11, %s448_s11, %s449_s12  }
  0x33   :  { %441 = dma.done.wait [#allocation3], 128  }
  0x34   :  { %442 = vsyncadd [#allocation3], 4294967168 }
  0x35   :  { %443 = dma.done.wait [#allocation6], 512  }
  0x36   :  { %444 = vsyncadd [#allocation6], 4294966784  ;;  %v452_v0 = vmov 0.0   ;;  %vm453_vm0 = vmmov 0   ;;  %v347_v1 = vld [vmem:[#allocation5] sm:$0xff]   ;;  %v348_v2 = vld [vmem:[#allocation5 + $0x8] sm:$0xff]  }
  0x37   :  { %315 = vmatprep.subr.bf16.mxu0 %v452_v0  ;;  %319 = vmatprep.mubr.msk.bf16.mxu0 %vm453_vm0, %v452_v0  ;;  %v67_v3 = vld [vmem:[#allocation2] sm:$0xff]  ;;  %vm92_vm1 = vcmask 261120   ;;  %v349_v5 = vld [vmem:[#allocation7] sm:$0xff]   ;;  %v294_v7 = vld [vmem:[%s570_s2] ss:$0 sm:$0xff] }
  0x38   :  { %323 = vmatprep.subr.bf16.mxu1 %v452_v0  ;;  %327 = vmatprep.mubr.msk.bf16.mxu1 %vm453_vm0, %v452_v0  ;;  %v68_v4 = vpack.c.bf16 %v67_v3, %v67_v3  ;;  %v350_v6 = vld [vmem:[#allocation7 + $0x8] sm:$0xff]   ;;  %v351_v16 = vld [vmem:[%s573_s5] sm:$0xff]   ;;  %v352_v17 = vld [vmem:[%s573_s5 + $0x8] sm:$0xff]   ;;  %s454_s5 = smov [#allocation8]  }
  0x39   :  { %316 = vmatpush3.bf16.msra.mxu0 %v347_v1  ;;  %324 = vmatpush3.bf16.msra.mxu1 %v349_v5  ;;  %v298_v18 = vld [vmem:[%s572_s4] ss:$0 sm:$0xff]  ;;  %s284_s22 = sshll.u32 %s454_s5, 4  ;;  %s285_s22 = int_to_ptr.vmem [resolvable:$true] %s284_s22 }
  0x3a   :  { %317 = vmatprep.subr.bf16.mxu0 %v452_v0  ;;  %325 = vmatprep.subr.bf16.mxu1 %v452_v0  ;;  %v302_v27 = vld [vmem:[%s574_s6] ss:$0 sm:$0xff]  ;;  %s419_s4 = scalar_lea.vmem %s285_s22, 128  ;;  %p424_p11 = scmp.lt.s32.totalorder %s285_s22, %s285_s22 }
  0x3b   :  { %p420_p10 = scmp.ne.s32.totalorder %s285_s22, %s419_s4  ;;  %p425_p12 = scmp.lt.s32.totalorder %s419_s4, %s419_s4 }
  0x3d   :  { %318 = vmatpush3.bf16.msra.mxu0 %v348_v2  ;;  %326 = vmatpush3.bf16.msra.mxu1 %v350_v6  ;;  %p426_p13 = por %p425_p12, %p424_p11 }
  0x3e   :  { %331 = vmatprep.subr.bf16.mxu0 %v452_v0 }
  0x3f   :  { %p427_p0 = pnand %p426_p13, %p420_p10 }
  0x40   :  { %320 = vmatmul.mubr.msk.bf16.vlgmr.msra.gmra.mrb[0].mxu0 %vm92_vm1, %v68_v4 }
  0x41   :  { %335 = vmatprep.mubr.msk.bf16.mxu0 %vm453_vm0, %v452_v0  ;;  %332 = vmatpush3.bf16.msra.mxu0 %v351_v16 }
  0x42   :  { %333 = vmatprep.subr.bf16.mxu0 %v452_v0 }
  0x45   :  { %334 = vmatpush3.bf16.msra.mxu0 %v352_v17 }
 0x113   :  { %v130_v8 = vpop.f32.mrb[0].mxu0 }
 0x114   :  { %v131_v9 = vadd.f32 %v294_v7, %v130_v8  ;;  %v321_v10 = vpop.f32.mrb[1].mxu0 }
 0x115   :  { %v133_v11 = vpop.f32.mrb[2].mxu0 }
 0x116   :  { %vm136_vm2 = vcmp.gt.f32.partialorder %v131_v9, 0.0  ;;  %v137_v12 = vmul.f32 0.01, %v131_v9  ;;  %v322_v13 = vpop.f32.mrb[3].mxu0 }
 0x118   :  { %v138_v14 = vsel %vm136_vm2, %v131_v9, %v137_v12 }
 0x119   :  { %v139_v15 = vpack.c.bf16 %v138_v14, %v138_v14 }
 0x11b   :  { %328 = vmatmul.mubr.msk.bf16.vlgmr.msra.gmra.mrb[0].mxu1 %vm92_vm1, %v139_v15 }
 0x1ee   :  { %v200_v19 = vpop.f32.mrb[0].mxu1 }
 0x1ef   :  { %v201_v20 = vadd.f32 %v298_v18, %v200_v19  ;;  %v329_v21 = vpop.f32.mrb[1].mxu1 }
 0x1f0   :  { %v203_v22 = vpop.f32.mrb[2].mxu1 }
 0x1f1   :  { %vm206_vm3 = vcmp.gt.f32.partialorder %v201_v20, 0.0  ;;  %v207_v23 = vmul.f32 0.01, %v201_v20  ;;  %v330_v24 = vpop.f32.mrb[3].mxu1 }
 0x1f3   :  { %v208_v25 = vsel %vm206_vm3, %v201_v20, %v207_v23 }
 0x1f4   :  { %v209_v26 = vpack.c.bf16 %v208_v25, %v208_v25 }
 0x1f6   :  { %336 = vmatmul.mubr.msk.bf16.vlgmr.msra.gmra.mrb[4].mxu0 %vm92_vm1, %v209_v26 }
 0x2c9   :  { %v270_v28 = vpop.f32.mrb[4].mxu0 }
 0x2ca   :  { %v271_v29 = vadd.f32 %v302_v27, %v270_v28  ;;  %v337_v30 = vpop.f32.mrb[5].mxu0 }
 0x2cb   :  { %v273_v31 = vpop.f32.mrb[6].mxu0 }
 0x2cc   :  { %v276_v32 = vadd.f32 %v271_v29, %v67_v3  ;;  %v338_v33 = vpop.f32.mrb[7].mxu0 }
 0x2ce   :  { %277 = vst.msk [vmem:[#allocation8] sm:$0xff] %vm92_vm1, %v276_v32 }
 0x2cf   :  { %430 = shalt.err (!%p427_p0)
}
 0x2d0   :  { %s431_s24 = scalar_lea.hbm %s575_s7, 128 }
 0x2d1   :  { %p432_p1 = scmp.ne.s32.totalorder %s575_s7, %s431_s24  ;;  %p435_p2 = scmp.lt.u32.totalorder %s431_s24, %s575_s7 }
 0x2d3   :  { %p437_p3 = pnand %p435_p2, %p432_p1 }
 0x2d5   :  { %440 = shalt.err (!%p437_p3)
}
 0x2d6   :  { %287 = dma.vmem_to_hbm [thread:$0]  %s285_s22, 128, %s575_s7, [#allocation4]  }
 0x2d7   :  { %445 = dma.done.wait [#allocation4], 128  }
 0x2d8   :  { %446 = vsyncadd [#allocation4], 4294967168 }
 0x2d9   :  { %291 = vsyncpa [#allocation3], 1 }
 0x2da   :  { %292 = vsyncpa [#allocation6], 1 }
 0x2db   :  { %293 = vsyncpa [#allocation4], 1 }

</bundles_post_ra>
